<compile_context>
chip_gen: v5e
topology: v5e:2x2
jax: 0.10.0
libtpu: 0.0.40
codegen_flags: <defaults>
</compile_context>

<pallas_src>
import jax
import jax.numpy as jnp
from jax import lax
from jax.experimental import pallas as pl
from jax.experimental.pallas import tpu as pltpu


def _round_up(v, m):
    return (v + m - 1) // m * m


def _vmem_budget_bytes():
    """Generation-aware scoped-VMEM budget (leaves headroom for the compiler)."""
    try:
        cap = int(pltpu.get_tpu_info().vmem_capacity_bytes)
    except Exception:  # query unavailable -> assume the smallest generation (v7x)
        cap = 64 << 20
    # ~80% of physical with >= 8 MiB headroom:
    #   v5e/v6e (128 MiB) -> ~102 MiB,   v7x (64 MiB) -> ~51 MiB.
    return max(32 << 20, min(int(0.80 * cap), cap - (8 << 20)))


def _resident_kernel(matmul_dtype):
    """Fused (x @ W + b + x) for one (TM, H) tile; W fully resident in VMEM."""

    def kernel(x_ref, w_ref, b_ref, o_ref):
        x = x_ref[...]
        lhs = x.astype(matmul_dtype)                       # no-op if same dtype
        rhs = w_ref[...].astype(matmul_dtype)              # no-op if same dtype
        y = jnp.dot(lhs, rhs, preferred_element_type=jnp.float32)
        o_ref[...] = (y + b_ref[...].astype(jnp.float32)
                      + x.astype(jnp.float32)).astype(o_ref.dtype)

    return kernel


def _streamed_kernel(tn, matmul_dtype, cache_lhs):
    """Fused (x @ W + b + x) with W streamed in (H, TN) column blocks.

    If `cache_lhs`, the cast of the resident (TM, H) x tile to the matmul dtype
    is done once per M tile (at j == 0) into a VMEM scratch and reused across
    the whole j sweep.
    """

    def kernel(x_ref, w_ref, b_ref, o_ref, *scratch):
        j = pl.program_id(1)

        if cache_lhs:
            (xl_ref,) = scratch

            @pl.when(j == 0)
            def _():
                xl_ref[...] = x_ref[...].astype(matmul_dtype)

            lhs = xl_ref[...]
        else:
            lhs = x_ref[...].astype(matmul_dtype)          # no-op if same dtype

        rhs = w_ref[...].astype(matmul_dtype)              # no-op if same dtype
        y = jnp.dot(lhs, rhs, preferred_element_type=jnp.float32)

        # Residual slice of x matching this tile's N-columns (f32 skip).
        n0 = pl.multiple_of(j * tn, tn)
        x_res = x_ref[:, pl.ds(n0, tn)].astype(jnp.float32)

        o_ref[...] = (y + b_ref[...].astype(jnp.float32) + x_res).astype(o_ref.dtype)

    return kernel


def residual_linear(x, w, b, *, tm=None, force_stream_tn=None):
    """Residual(fn)(x) = fn(x) + x with fn(x) = x @ w + b, fused in one kernel.

    x: [batch, seq, hidden]   w: [hidden, hidden]   b: [hidden]

    Caller contract (perf): pass `w` already in the dtype you want on the MXU
    (persist a bf16 copy once at the call site to halve W DMA traffic — this
    function never re-casts W in HBM).  x / out dtype pass through, so bf16
    activations halve the x/out HBM streams when hidden is small (mem-bound).
    `force_stream_tn` is a test-only knob that forces the streamed-W path.
    """
    batch, seq, hidden = x.shape
    m = batch * seq
    x2d = x.reshape(m, hidden)
    b2d = b.reshape(1, hidden)

    matmul_dtype = (jnp.bfloat16
                    if jnp.dtype(w.dtype) == jnp.dtype(jnp.bfloat16)
                    else jnp.float32)
    x_itemsize = jnp.dtype(x.dtype).itemsize
    w_itemsize = jnp.dtype(w.dtype).itemsize
    b_itemsize = jnp.dtype(b2d.dtype).itemsize
    lhs_itemsize = jnp.dtype(matmul_dtype).itemsize

    budget = _vmem_budget_bytes()
    w_bytes = hidden * hidden * w_itemsize

    # ---- resident-W vs streamed-W decision (generation aware) -------------
    # Keep the whole W in VMEM when it uses <= ~45% of the scoped budget
    # (v5e/v6e: ~46 MiB so hidden=4096 bf16 W (32 MiB) stays resident;
    #  v7x: ~23 MiB).  Streaming W re-reads it from HBM once per M tile.
    resident = force_stream_tn is None and (
        hidden <= 512 or w_bytes <= int(0.45 * budget))

    # Single-buffer the resident W / bias (their block index never changes);
    # only bother when it frees meaningful VMEM.
    single_buffer_w = resident and w_bytes >= (2 << 20)

    # ---- N-dim padding fallback for awkward hidden (streamed path only) ---
    hidden_eff = hidden
    if not resident and hidden % 128 != 0:
        hidden_eff = _round_up(hidden, 128)

    # ---- tile sizes --------------------------------------------------------
    if tm is None:
        tm = 512 if budget >= (80 << 20) else 256   # bigger M tiles on 128 MiB gens
    tm = min(tm, m)

    if resident:
        tn = hidden_eff
    else:
        if force_stream_tn is not None:
            tn = force_stream_tn
        else:
            tn = 128
            for cand in (512, 256, 128):            # 384 dropped: 256-wide MXUs
                if hidden_eff % cand == 0:
                    tn = cand
                    break
        assert hidden_eff % tn == 0 and tn % 128 == 0, "tn must be lane-dense"

    cache_lhs = (not resident) and (jnp.dtype(matmul_dtype) != jnp.dtype(x.dtype))

    def footprint(tm_, tn_):
        w_copies = 1 if single_buffer_w else 2
        fp = 2 * tm_ * hidden_eff * x_itemsize           # x tiles (double buffered)
        fp += w_copies * hidden_eff * tn_ * w_itemsize   # W tiles
        fp += w_copies * tn_ * b_itemsize                # bias tiles
        fp += 2 * tm_ * tn_ * x_itemsize                 # out tiles
        if cache_lhs:
            fp += tm_ * hidden_eff * lhs_itemsize        # cached lhs scratch
        return fp

    def shrink_tn(tn_):
        for cand in (256, 128):
            if cand < tn_ and hidden_eff % cand == 0:
                return cand
        return tn_

    # Fit into the scoped budget: on the streamed path shrink TN before TM
    # (W re-fetch HBM traffic scales with 1/TM, not 1/TN), then TM.
    while footprint(tm, tn) > budget:
        if not resident and tn > 128:
            new_tn = shrink_tn(tn)
            if new_tn != tn:
                tn = new_tn
                continue
        if tm > 64:
            tm = max(64, tm // 2)
            continue
        break

    # ---- pad inputs only when an awkward hidden is streamed ----------------
    w_in, b_in = w, b2d
    if hidden_eff != hidden:
        pad = hidden_eff - hidden
        x2d = jnp.pad(x2d, ((0, 0), (0, pad)))
        w_in = jnp.pad(w, ((0, pad), (0, pad)))
        b_in = jnp.pad(b2d, ((0, 0), (0, pad)))

    fp = footprint(tm, tn)
    vmem_limit = int(min(budget, max(32 << 20, fp + (8 << 20))))

    m_tiles = pl.cdiv(m, tm)
    w_reads = 1 if resident else m_tiles
    cost = pl.CostEstimate(
        flops=2 * m * hidden_eff * hidden_eff + 2 * m * hidden_eff,
        transcendentals=0,
        bytes_accessed=(m * hidden_eff * x_itemsize
                        + w_reads * hidden_eff * hidden_eff * w_itemsize
                        + hidden_eff * b_itemsize
                        + m * hidden_eff * x_itemsize),
    )

    # NOTE: input_output_aliases={0: 0} would let the output reuse x's HBM
    # buffer, but it donates x and breaks callers that still hold/reuse x, so
    # it is intentionally not enabled here.
    if resident:
        w_spec_kwargs = dict(pipeline_mode=pl.Buffered(1)) if single_buffer_w else {}
        out2d = pl.pallas_call(
            _resident_kernel(matmul_dtype),
            out_shape=jax.ShapeDtypeStruct((m, hidden_eff), x.dtype),
            grid_spec=pltpu.PrefetchScalarGridSpec(
                num_scalar_prefetch=0,
                grid=(m_tiles,),
                in_specs=[
                    pl.BlockSpec((tm, hidden_eff), lambda i: (i, 0)),
                    pl.BlockSpec((hidden_eff, hidden_eff), lambda i: (0, 0),
                                 **w_spec_kwargs),
                    pl.BlockSpec((1, hidden_eff), lambda i: (0, 0),
                                 **w_spec_kwargs),
                ],
                out_specs=pl.BlockSpec((tm, hidden_eff), lambda i: (i, 0)),
            ),
            compiler_params=pltpu.CompilerParams(
                dimension_semantics=("parallel",),
                vmem_limit_bytes=vmem_limit,
            ),
            cost_estimate=cost,
        )(x2d, w_in, b_in)
    else:
        scratch_shapes = ([pltpu.VMEM((tm, hidden_eff), matmul_dtype)]
                          if cache_lhs else [])
        out2d = pl.pallas_call(
            _streamed_kernel(tn, matmul_dtype, cache_lhs),
            out_shape=jax.ShapeDtypeStruct((m, hidden_eff), x.dtype),
            grid_spec=pltpu.PrefetchScalarGridSpec(
                num_scalar_prefetch=0,
                grid=(m_tiles, hidden_eff // tn),
                in_specs=[
                    # x tile stays resident across the inner N sweep.
                    pl.BlockSpec((tm, hidden_eff), lambda i, j: (i, 0)),
                    pl.BlockSpec((hidden_eff, tn), lambda i, j: (0, j)),
                    pl.BlockSpec((1, tn), lambda i, j: (0, j)),
                ],
                out_specs=pl.BlockSpec((tm, tn), lambda i, j: (i, j)),
                scratch_shapes=scratch_shapes,
            ),
            compiler_params=pltpu.CompilerParams(
                # j carries the cached lhs cast -> must iterate sequentially.
                dimension_semantics=("parallel", "arbitrary"),
                vmem_limit_bytes=vmem_limit,
            ),
            cost_estimate=cost,
        )(x2d, w_in, b_in)

    if hidden_eff != hidden:
        out2d = out2d[:, :hidden]
    return out2d.reshape(batch, seq, hidden)


if __name__ == "__main__":
    key = jax.random.PRNGKey(0)
    kx, kw, kb, kx2, kw2, kb2 = jax.random.split(key, 6)

    # ---- test 1: resident-W path (small hidden, single M block) -----------
    batch, seq, hidden = 2, 8, 32
    x = jax.random.normal(kx, (batch, seq, hidden), dtype=jnp.float32)
    w = jax.random.normal(kw, (hidden, hidden), dtype=jnp.float32) / hidden ** 0.5
    b = jax.random.normal(kb, (hidden,), dtype=jnp.float32) * 0.01
    ref = jnp.einsum("bsh,hk->bsk", x, w,
                     precision=lax.Precision.HIGHEST) + b + x

    out_f32 = residual_linear(x, w, b)                 # f32 MXU path
    jax.block_until_ready(out_f32)
    assert jnp.allclose(out_f32, ref, atol=1e-5, rtol=1e-5), "resident f32 mismatch"

    w_bf16 = w.astype(jnp.bfloat16)                    # caller persists bf16 W once
    out_bf16 = residual_linear(x, w_bf16, b)
    jax.block_until_ready(out_bf16)
    assert jnp.allclose(out_bf16, ref, atol=5e-2, rtol=5e-2), "resident bf16 mismatch"

    # ---- test 2: streamed-W path (forced at a small shape) ----------------
    hidden2 = 256
    x2 = jax.random.normal(kx2, (batch, seq, hidden2), dtype=jnp.float32)
    w2 = jax.random.normal(kw2, (hidden2, hidden2), dtype=jnp.float32) / hidden2 ** 0.5
    b2 = jax.random.normal(kb2, (hidden2,), dtype=jnp.float32) * 0.01
    ref2 = jnp.einsum("bsh,hk->bsk", x2, w2,
                      precision=lax.Precision.HIGHEST) + b2 + x2

    out2_f32 = residual_linear(x2, w2, b2, force_stream_tn=128)
    jax.block_until_ready(out2_f32)
    assert jnp.allclose(out2_f32, ref2, atol=1e-3, rtol=1e-3), "streamed f32 mismatch"

    out2_bf16 = residual_linear(x2, w2.astype(jnp.bfloat16), b2, force_stream_tn=128)
    jax.block_until_ready(out2_bf16)
    assert jnp.allclose(out2_bf16, ref2, atol=5e-2, rtol=5e-2), "streamed bf16 mismatch"

    print("KERNEL_OK")
</pallas_src>

<mosaic_0001>
module attributes {stable_mosaic.version = 11 : i64} {
  func.func @kernel(%arg0: i32, %arg1: memref<16x32xf32, #tpu.memory_space<vmem>>, %arg2: memref<32x32xf32, #tpu.memory_space<vmem>>, %arg3: memref<1x32xf32, #tpu.memory_space<vmem>>, %arg4: memref<16x32xf32, #tpu.memory_space<vmem>>) attributes {dimension_semantics = [#tpu.dimension_semantics<parallel>], iteration_bounds = array<i64: 1>, scalar_prefetch = 0 : i64, scratch_operands = 0 : i64, tpu.core_type = #tpu.core_type<tc>, window_params = [{transform_indices = @transform_0, window_bounds = array<i64: 16, 32>}, {pipeline_mode = #tpu.pipeline_mode<synchronous>, transform_indices = @transform_1, window_bounds = array<i64: 32, 32>}, {pipeline_mode = #tpu.pipeline_mode<synchronous>, transform_indices = @transform_2, window_bounds = array<i64: 1, 32>}, {transform_indices = @transform_3, window_bounds = array<i64: 16, 32>}]} {
    %c0 = arith.constant 0 : index
    %c0_0 = arith.constant 0 : index
    %0 = vector.load %arg1[%c0, %c0_0] : memref<16x32xf32, #tpu.memory_space<vmem>>, vector<16x32xf32>
    %c0_1 = arith.constant 0 : index
    %c0_2 = arith.constant 0 : index
    %1 = vector.load %arg2[%c0_1, %c0_2] : memref<32x32xf32, #tpu.memory_space<vmem>>, vector<32x32xf32>
    %cst = arith.constant dense<0.000000e+00> : vector<16x32xf32>
    %2 = tpu.matmul %0, %1, %cst {dimension_numbers = #tpu.dot_dimension_numbers<[1], [0], [0], [1], [0, 0, 1, 1], [], []>} : vector<16x32xf32>, vector<32x32xf32>, vector<16x32xf32> -> vector<16x32xf32>
    %c0_3 = arith.constant 0 : index
    %c0_4 = arith.constant 0 : index
    %3 = vector.load %arg3[%c0_3, %c0_4] : memref<1x32xf32, #tpu.memory_space<vmem>>, vector<1x32xf32>
    %4 = vector.broadcast %3 : vector<1x32xf32> to vector<16x32xf32>
    %5 = arith.addf %2, %4 : vector<16x32xf32>
    %6 = arith.addf %5, %0 : vector<16x32xf32>
    %c0_5 = arith.constant 0 : index
    %c0_6 = arith.constant 0 : index
    %7 = vector.load %arg4[%c0_5, %c0_6] : memref<16x32xf32, #tpu.memory_space<vmem>>, vector<16x32xf32>
    tpu.vector_store %arg4[%c0_5, %c0_6], %6 {strides = array<i32>} : memref<16x32xf32, #tpu.memory_space<vmem>>, vector<16x32xf32>,
    return
  }
  func.func @transform_0(%arg0: i32) -> (i32, i32) {
    %c0_i32 = arith.constant 0 : i32
    %c0_i32_0 = arith.constant 0 : i32
    return %arg0, %c0_i32 : i32, i32
  }
  func.func @transform_1(%arg0: i32) -> (i32, i32) {
    %c0_i32 = arith.constant 0 : i32
    %c0_i32_0 = arith.constant 0 : i32
    %c0_i32_1 = arith.constant 0 : i32
    return %c0_i32, %c0_i32_0 : i32, i32
  }
  func.func @transform_2(%arg0: i32) -> (i32, i32) {
    %c0_i32 = arith.constant 0 : i32
    %c0_i32_0 = arith.constant 0 : i32
    %c0_i32_1 = arith.constant 0 : i32
    return %c0_i32, %c0_i32_0 : i32, i32
  }
  func.func @transform_3(%arg0: i32) -> (i32, i32) {
    %c0_i32 = arith.constant 0 : i32
    %c0_i32_0 = arith.constant 0 : i32
    return %arg0, %c0_i32 : i32, i32
  }
}

</mosaic_0001>

<bundles_post_ra>
// kernel: tpu_custom_call.1
= control target key start
LH: loop header
LB: loop body
LE: loop exit
PB: predicated region body
PF: predicated region fallthrough
CT: control target
= control target key end

     0   :  { %8 = vsyncpa [#allocation3], 0  ;;  %s251_s0 = inlined_call_operand.hbm [shape: f32[16,32], index: 0, kind: input, shape index: {}]   ;;  %s252_s1 = inlined_call_operand.hbm [shape: f32[32,32], index: 1, kind: input, shape index: {}]   ;;  %s253_s2 = inlined_call_operand.vmem [shape: f32[1,32], index: 2, kind: input, shape index: {}]   ;;  %s254_s3 = inlined_call_operand.hbm [shape: f32[16,32], index: 3, kind: output, shape index: {}]  }
   0x1   :  { %9 = vsyncpa [#allocation6], 0 }
   0x2   :  { %10 = vsyncpa [#allocation4], 0  ;;  %s15_s14 = sshll.u32 %s251_s0, 4  ;;  %s201_s15 = smov [#allocation2]   ;;  %s16_s14 = int_to_ptr.hbm [resolvable:$true] %s15_s14 }
   0x3   :  { %s17_s16 = sshll.u32 %s201_s15, 4  ;;  %s28_s19 = sshll.u32 %s252_s1, 4  ;;  %s18_s16 = int_to_ptr.vmem [resolvable:$true] %s17_s16  ;;  %s29_s19 = int_to_ptr.hbm [resolvable:$true] %s28_s19 }
   0x4   :  { %s202_s20 = smov 128   ;;  %s203_s21 = smov 8  }
   0x5   :  { %23 = dma.hbm_to_vmem [thread:$0]  %s16_s14, 256, %s18_s16, [#allocation3], %s202_s20, %s202_s20, %s203_s21  }
   0x6   :  { %s204_s22 = smov [#allocation5]  }
   0x7   :  { %s30_s23 = sshll.u32 %s204_s22, 4  ;;  %s31_s23 = int_to_ptr.vmem [resolvable:$true] %s30_s23 }
   0x8   :  { %36 = dma.hbm_to_vmem [thread:$0]  %s29_s19, 512, %s31_s23, [#allocation6], %s202_s20, %s202_s20, %s203_s21  }
   0x9   :  { %195 = dma.done.wait [#allocation3], 256  }
   0xa   :  { %196 = vsyncadd [#allocation3], 4294967040 }
   0xb   :  { %197 = dma.done.wait [#allocation6], 512  }
   0xc   :  { %198 = vsyncadd [#allocation6], 4294966784  ;;  %v52_v0 = vld [vmem:[#allocation5 + $0x18] sm:$0xff]  ;;  %v51_v1 = vld [vmem:[#allocation5 + $0x10] sm:$0xff]  ;;  %vm57_vm0 = vcmask 261120   ;;  %s205_s24 = smov [#allocation7]  }
   0xd   :  { %76 = vmatpush.msra.mxu0 %v52_v0  ;;  %113 = vmatpush.msra.mxu1 %v52_v0  ;;  %v50_v2 = vld [vmem:[#allocation5 + $0x8] sm:$0xff]  ;;  %v49_v3 = vld [vmem:[#allocation5] sm:$0xff]  ;;  %v47_v4 = vld [vmem:[#allocation2] sm:$0xff]  ;;  %s95_s25 = sshll.u32 %s205_s24, 4  ;;  %s97_s28 = sshll.u32 %s254_s3, 4  ;;  %s96_s25 = int_to_ptr.vmem [resolvable:$true] %s95_s25  ;;  %s98_s28 = int_to_ptr.hbm [resolvable:$true] %s97_s28 }
   0xe   :  { %v48_v5 = vld [vmem:[#allocation2 + $0x8] sm:$0xff]  ;;  %v122_v6 = vld [vmem:[%s253_s2] ss:$0 sm:$0xff] }
   0xf   :  { %77 = vmatpush.msra.mxu0 %v51_v1  ;;  %114 = vmatpush.msra.mxu1 %v51_v1 }
  0x11   :  { %78 = vmatpush.msra.mxu0 %v50_v2  ;;  %115 = vmatpush.msra.mxu1 %v50_v2 }
  0x13   :  { %79 = vmatpush.msra.mxu0 %v49_v3  ;;  %116 = vmatpush.msra.mxu1 %v49_v3 }
  0x14   :  { %111 = vmatmul.msk.f32.vlgmr.msra.gmra.mxu0 %vm57_vm0, %v47_v4  ;;  %112 = vmatmul.msk.f32.vlgmr.msra.gmra.mxu1 %vm57_vm0, %v48_v5 }
  0x91   :  { %v81_v7 = vpop.f32.mrf.mxu0  ;;  %v84_v8 = vpop.f32.mrf.mxu1 }
  0x92   :  { %v82_v9 = vadd.f32 %v122_v6, %v81_v7  ;;  %v85_v10 = vadd.f32 %v122_v6, %v84_v8 }
  0x94   :  { %v87_v11 = vadd.f32 %v82_v9, %v47_v4  ;;  %v88_v12 = vadd.f32 %v85_v10, %v48_v5 }
  0x96   :  { %89 = vst.msk [vmem:[#allocation7] sm:$0xff] %vm57_vm0, %v87_v11 }
  0x97   :  { %90 = vst.msk [vmem:[#allocation7 + $0x8] sm:$0xff] %vm57_vm0, %v88_v12 }
  0x98   :  { %103 = dma.vmem_to_hbm [thread:$0]  %s96_s25, 256, %s98_s28, [#allocation4], %s202_s20, %s202_s20, %s203_s21  }
  0x99   :  { %199 = dma.done.wait [#allocation4], 256  }
  0x9a   :  { %200 = vsyncadd [#allocation4], 4294967040 }
  0x9b   :  { %108 = vsyncpa [#allocation3], 1 }
  0x9c   :  { %109 = vsyncpa [#allocation6], 1 }
  0x9d   :  { %110 = vsyncpa [#allocation4], 1 }

</bundles_post_ra>
